<compile_context>
chip_gen: v7x
topology: tpu7x:2x2x1
jax: 0.10.0
libtpu: 0.0.40
codegen_flags: <defaults>
</compile_context>

<pallas_src>
import jax
import jax.numpy as jnp
from jax.experimental import pallas as pl
from jax.experimental.pallas import tpu as pltpu

NUM_CLASSES = 104
PADDED_CLASSES = 128        # lane-dense class dim for the in-VMEM softmax
HIDDEN = 32


def _cdiv(a, b):
    return (a + b - 1) // b


def _choose_batch_tile(num_features):
    """Largest batch tile whose double-buffered f32 x / f32 out streams fit a
    conservative VMEM stream budget (leaves room for weights + Mosaic scratch
    even on v7x's 64 MiB)."""
    stream_per_row = 2 * num_features * 4 + 2 * NUM_CLASSES * 4
    resident_weight_bytes = 2 * (num_features * HIDDEN * 2)     # w1 bf16, worst case 2 bufs
    budget = (30 << 20) - resident_weight_bytes
    min_budget = stream_per_row * 8
    if budget < min_budget:
        # TODO(synk): add a K-tiled (feature-axis) grid with an h1 VMEM
        # accumulator for num_features so large that even an 8-row tile plus a
        # resident w1 overflow VMEM; current fallback may still OOM there.
        budget = min_budget
    tb = budget // stream_per_row
    if tb >= 128:
        return min(8192, (tb // 128) * 128)      # fill MXU M dim when possible
    return max(8, (tb // 8) * 8)


def _mlp_softmax_kernel(x_ref, w1_ref, b1_ref, w2_ref, b2_ref, w3_ref, b3_ref,
                        o_ref):
    # In-kernel bf16 cast of x (documented precision choice vs f32 Linear).
    x = x_ref[...].astype(jnp.bfloat16)                       # (TB, F)

    # layer_1 + ReLU  (dropout = identity at inference)
    h1 = jnp.dot(x, w1_ref[...], preferred_element_type=jnp.float32)
    h1 = jnp.maximum(h1 + b1_ref[...], 0.0)                   # (TB, 32) f32

    # layer_2 + ReLU  (dropout = identity at inference)
    h2 = jnp.dot(h1, w2_ref[...], preferred_element_type=jnp.float32)
    h2 = jnp.maximum(h2 + b2_ref[...], 0.0)                   # (TB, 32) f32

    # layer_out: class dim padded to 128 lanes (pad bias = -1e30 -> exp == 0)
    logits = jnp.dot(h2, w3_ref[...], preferred_element_type=jnp.float32)
    logits = logits + b3_ref[...]                             # (TB, 128) f32

    # softmax over the class axis, in f32; pad lanes contribute exactly 0
    m = jnp.max(logits, axis=-1, keepdims=True)
    e = jnp.exp(logits - m)
    denom = jnp.sum(e, axis=-1, keepdims=True)
    inv = pl.reciprocal(denom, approx=True)                   # EUP vrcp
    inv = inv * (2.0 - denom * inv)                           # Newton -> ~f32 exact
    # Store only the 104 real classes (out block last dim == full array dim).
    o_ref[...] = (e[:, :NUM_CLASSES] * inv).astype(o_ref.dtype)


def prepare_params(params):
    """One-time conversion of PyTorch-layout (out,in) weights into the kernel
    layout.  Cache/reuse the returned tuple across forward calls."""
    w1 = jnp.asarray(params["w1"]).T.astype(jnp.bfloat16)               # (F, 32)
    b1 = jnp.asarray(params["b1"]).reshape(1, -1).astype(jnp.float32)   # (1, 32)
    w2 = jnp.asarray(params["w2"]).T.astype(jnp.float32)                # (32, 32)
    b2 = jnp.asarray(params["b2"]).reshape(1, -1).astype(jnp.float32)   # (1, 32)
    w3 = jnp.asarray(params["w3"]).T.astype(jnp.float32)                # (32, 104)
    w3p = jnp.zeros((HIDDEN, PADDED_CLASSES), jnp.float32)
    w3p = w3p.at[:, :NUM_CLASSES].set(w3)
    b3p = jnp.full((1, PADDED_CLASSES), -1e30, jnp.float32)
    b3p = b3p.at[:, :NUM_CLASSES].set(
        jnp.asarray(params["b3"]).reshape(1, -1).astype(jnp.float32))
    return (w1, b1, w2, b2, w3p, b3p)


def _run_pallas(x, weights, tb, n_tiles, num_features, vmem_limit, cost,
                single_buffer_weights):
    const = lambda i: (0, 0)
    if single_buffer_weights:
        wspec = lambda shape: pl.BlockSpec(shape, const,
                                           pipeline_mode=pl.Buffered(1))
    else:
        wspec = lambda shape: pl.BlockSpec(shape, const)
    batch = x.shape[0]
    return pl.pallas_call(
        _mlp_softmax_kernel,
        out_shape=jax.ShapeDtypeStruct((batch, NUM_CLASSES), jnp.float32),
        grid=(n_tiles,),
        in_specs=[
            pl.BlockSpec((tb, num_features), lambda i: (i, 0)),   # x tile (f32)
            wspec((num_features, HIDDEN)),                        # w1 (resident, bf16)
            wspec((1, HIDDEN)),                                   # b1
            wspec((HIDDEN, HIDDEN)),                              # w2
            wspec((1, HIDDEN)),                                   # b2
            wspec((HIDDEN, PADDED_CLASSES)),                      # w3 (padded)
            wspec((1, PADDED_CLASSES)),                           # b3 (padded)
        ],
        out_specs=pl.BlockSpec((tb, NUM_CLASSES), lambda i: (i, 0)),
        compiler_params=pltpu.CompilerParams(
            dimension_semantics=("parallel",),
            vmem_limit_bytes=vmem_limit,
        ),
        cost_estimate=cost,
    )(x, *weights)


def pytorch_multiclass_forward(x, params):
    """x: (batch, num_features) float32.
    params: either a PyTorch-layout dict or a prepare_params() tuple."""
    prepared = params if isinstance(params, tuple) else prepare_params(params)
    batch, num_features = x.shape
    x = x.astype(jnp.float32)          # keep f32 in HBM; bf16 cast is in-kernel

    # Batch tile: biggest that fits the VMEM stream budget, but never larger
    # than the (sublane-aligned) batch so ragged tails stay within bounds.
    tb_budget = _choose_batch_tile(num_features)
    tb_cap = batch if batch <= 8 else (batch // 8) * 8
    tb = max(1, min(tb_budget, tb_cap))
    # Keep >=2 grid steps for large batches so the 'parallel' axis can be
    # split across both TensorCores on v7x.
    if batch >= 256 and _cdiv(batch, tb) < 2:
        tb = max(128, ((_cdiv(batch, 2) + 7) // 8) * 8)
    n_tiles = _cdiv(batch, tb)

    # VMEM budget: double-buffered streams + (worst-case double-buffered)
    # resident weights + headroom, capped at 46 MiB for v7x safety.
    stream_bytes = 2 * tb * num_features * 4 + 2 * tb * NUM_CLASSES * 4
    weight_bytes = (num_features * HIDDEN * 2
                    + (HIDDEN * HIDDEN + HIDDEN * PADDED_CLASSES
                       + 2 * HIDDEN + PADDED_CLASSES) * 4)
    vmem_limit = stream_bytes + 2 * weight_bytes + (8 << 20)
    vmem_limit = int(max(32 << 20, min(vmem_limit, 46 << 20)))

    flops = 2 * batch * (num_features * HIDDEN + HIDDEN * HIDDEN
                         + HIDDEN * PADDED_CLASSES)
    cost = pl.CostEstimate(
        flops=flops,
        transcendentals=batch * (PADDED_CLASSES + 1),
        bytes_accessed=batch * num_features * 4 + batch * NUM_CLASSES * 4
                       + weight_bytes)

    try:
        # Preferred: single-buffered resident weights (saves VMEM on v7x).
        return _run_pallas(x, prepared, tb, n_tiles, num_features, vmem_limit,
                           cost, single_buffer_weights=True)
    except Exception:
        # Fallback if pipeline_mode=pl.Buffered(1) is rejected by this jax.
        return _run_pallas(x, prepared, tb, n_tiles, num_features, vmem_limit,
                           cost, single_buffer_weights=False)


def init_params(key, num_features):
    """Deterministic synthetic parameters with PyTorch nn.Linear shapes."""
    k1, k2, k3, k4, k5, k6 = jax.random.split(key, 6)
    scale = 0.1
    return {
        "w1": scale * jax.random.normal(k1, (HIDDEN, num_features), jnp.float32),
        "b1": scale * jax.random.normal(k2, (HIDDEN,), jnp.float32),
        "w2": scale * jax.random.normal(k3, (HIDDEN, HIDDEN), jnp.float32),
        "b2": scale * jax.random.normal(k4, (HIDDEN,), jnp.float32),
        "w3": scale * jax.random.normal(k5, (NUM_CLASSES, HIDDEN), jnp.float32),
        "b3": scale * jax.random.normal(k6, (NUM_CLASSES,), jnp.float32),
    }


def _reference_f32(x, p):
    """Plain-JAX f32 reference of the PyTorch forward (inference mode)."""
    h1 = jnp.maximum(x @ p["w1"].T + p["b1"], 0.0)
    h2 = jnp.maximum(h1 @ p["w2"].T + p["b2"], 0.0)
    logits = h2 @ p["w3"].T + p["b3"]
    return jax.nn.softmax(logits, axis=1)


def _reference_kernel_path(x, p):
    """Reference mirroring the kernel's data path (bf16 x / w1, f32 accum)."""
    xq = x.astype(jnp.bfloat16).astype(jnp.float32)
    w1q = p["w1"].astype(jnp.bfloat16).astype(jnp.float32)
    h1 = jnp.maximum(xq @ w1q.T + p["b1"], 0.0)
    h2 = jnp.maximum(h1 @ p["w2"].T + p["b2"], 0.0)
    logits = h2 @ p["w3"].T + p["b3"]
    return jax.nn.softmax(logits, axis=1)


def _check(out, x, params):
    assert out.shape == (x.shape[0], NUM_CLASSES)
    # Probabilities over the 104 real classes sum to 1 (pad lanes contribute 0).
    assert jnp.allclose(jnp.sum(out, axis=1), 1.0, atol=1e-5)
    # Tight check vs a reference following the kernel's bf16-input data path.
    assert jnp.allclose(out, _reference_kernel_path(x, params), atol=1e-4, rtol=1e-4)
    # Looser check vs the pure-f32 PyTorch-semantics reference.
    assert jnp.allclose(out, _reference_f32(x, params), atol=2e-3)


if __name__ == "__main__":
    key = jax.random.PRNGKey(0)
    kx, kx2, kp = jax.random.split(key, 3)

    num_features = 16
    params = init_params(kp, num_features)
    prepared = prepare_params(params)          # hoisted weight prep, reused below

    # Aligned batch.
    x = jax.random.normal(kx, (8, num_features), jnp.float32)
    out = jax.block_until_ready(pytorch_multiclass_forward(x, prepared))
    _check(out, x, params)

    # Ragged batch (exercises the partial last block / no-padding path).
    x2 = jax.random.normal(kx2, (13, num_features), jnp.float32)
    out2 = jax.block_until_ready(pytorch_multiclass_forward(x2, prepared))
    _check(out2, x2, params)

    print("KERNEL_OK")
</pallas_src>

<mosaic_0001>
module attributes {stable_mosaic.version = 11 : i64} {
  func.func @_mlp_softmax_kernel(%arg0: i32, %arg1: memref<8x16xf32, #tpu.memory_space<vmem>>, %arg2: memref<16x32xbf16, #tpu.memory_space<vmem>>, %arg3: memref<1x32xf32, #tpu.memory_space<vmem>>, %arg4: memref<32x32xf32, #tpu.memory_space<vmem>>, %arg5: memref<1x32xf32, #tpu.memory_space<vmem>>, %arg6: memref<32x128xf32, #tpu.memory_space<vmem>>, %arg7: memref<1x128xf32, #tpu.memory_space<vmem>>, %arg8: memref<8x104xf32, #tpu.memory_space<vmem>>) attributes {dimension_semantics = [#tpu.dimension_semantics<parallel>], iteration_bounds = array<i64: 1>, scalar_prefetch = 0 : i64, scratch_operands = 0 : i64, tpu.core_type = #tpu.core_type<tc>, window_params = [{transform_indices = @transform_0, window_bounds = array<i64: 8, 16>}, {pipeline_mode = #tpu.pipeline_mode<synchronous>, transform_indices = @transform_1, window_bounds = array<i64: 16, 32>}, {pipeline_mode = #tpu.pipeline_mode<synchronous>, transform_indices = @transform_2, window_bounds = array<i64: 1, 32>}, {pipeline_mode = #tpu.pipeline_mode<synchronous>, transform_indices = @transform_3, window_bounds = array<i64: 32, 32>}, {pipeline_mode = #tpu.pipeline_mode<synchronous>, transform_indices = @transform_4, window_bounds = array<i64: 1, 32>}, {pipeline_mode = #tpu.pipeline_mode<synchronous>, transform_indices = @transform_5, window_bounds = array<i64: 32, 128>}, {pipeline_mode = #tpu.pipeline_mode<synchronous>, transform_indices = @transform_6, window_bounds = array<i64: 1, 128>}, {transform_indices = @transform_7, window_bounds = array<i64: 8, 104>}]} {
    %c0 = arith.constant 0 : index
    %c0_0 = arith.constant 0 : index
    %0 = vector.load %arg1[%c0, %c0_0] : memref<8x16xf32, #tpu.memory_space<vmem>>, vector<8x16xf32>
    %1 = arith.truncf %0 : vector<8x16xf32> to vector<8x16xbf16>
    %c0_1 = arith.constant 0 : index
    %c0_2 = arith.constant 0 : index
    %2 = vector.load %arg2[%c0_1, %c0_2] : memref<16x32xbf16, #tpu.memory_space<vmem>>, vector<16x32xbf16>
    %cst = arith.constant dense<0.000000e+00> : vector<8x32xf32>
    %3 = tpu.matmul %1, %2, %cst {dimension_numbers = #tpu.dot_dimension_numbers<[1], [0], [0], [1], [0, 0, 1, 1], [], []>} : vector<8x16xbf16>, vector<16x32xbf16>, vector<8x32xf32> -> vector<8x32xf32>
    %c0_3 = arith.constant 0 : index
    %c0_4 = arith.constant 0 : index
    %4 = vector.load %arg3[%c0_3, %c0_4] : memref<1x32xf32, #tpu.memory_space<vmem>>, vector<1x32xf32>
    %5 = vector.broadcast %4 : vector<1x32xf32> to vector<8x32xf32>
    %6 = arith.addf %3, %5 : vector<8x32xf32>
    %cst_5 = arith.constant 0.000000e+00 : f32
    %7 = vector.broadcast %cst_5 : f32 to vector<8x32xf32>
    %8 = arith.maximumf %6, %7 : vector<8x32xf32>
    %c0_6 = arith.constant 0 : index
    %c0_7 = arith.constant 0 : index
    %9 = vector.load %arg4[%c0_6, %c0_7] : memref<32x32xf32, #tpu.memory_space<vmem>>, vector<32x32xf32>
    %cst_8 = arith.constant dense<0.000000e+00> : vector<8x32xf32>
    %10 = tpu.matmul %8, %9, %cst_8 {dimension_numbers = #tpu.dot_dimension_numbers<[1], [0], [0], [1], [0, 0, 1, 1], [], []>} : vector<8x32xf32>, vector<32x32xf32>, vector<8x32xf32> -> vector<8x32xf32>
    %c0_9 = arith.constant 0 : index
    %c0_10 = arith.constant 0 : index
    %11 = vector.load %arg5[%c0_9, %c0_10] : memref<1x32xf32, #tpu.memory_space<vmem>>, vector<1x32xf32>
    %12 = vector.broadcast %11 : vector<1x32xf32> to vector<8x32xf32>
    %13 = arith.addf %10, %12 : vector<8x32xf32>
    %cst_11 = arith.constant 0.000000e+00 : f32
    %14 = vector.broadcast %cst_11 : f32 to vector<8x32xf32>
    %15 = arith.maximumf %13, %14 : vector<8x32xf32>
    %c0_12 = arith.constant 0 : index
    %c0_13 = arith.constant 0 : index
    %16 = vector.load %arg6[%c0_12, %c0_13] : memref<32x128xf32, #tpu.memory_space<vmem>>, vector<32x128xf32>
    %cst_14 = arith.constant dense<0.000000e+00> : vector<8x128xf32>
    %17 = tpu.matmul %15, %16, %cst_14 {dimension_numbers = #tpu.dot_dimension_numbers<[1], [0], [0], [1], [0, 0, 1, 1], [], []>} : vector<8x32xf32>, vector<32x128xf32>, vector<8x128xf32> -> vector<8x128xf32>
    %c0_15 = arith.constant 0 : index
    %c0_16 = arith.constant 0 : index
    %18 = vector.load %arg7[%c0_15, %c0_16] : memref<1x128xf32, #tpu.memory_space<vmem>>, vector<1x128xf32>
    %19 = vector.broadcast %18 : vector<1x128xf32> to vector<8x128xf32>
    %20 = arith.addf %17, %19 : vector<8x128xf32>
    %cst_17 = arith.constant dense<0xFF800000> : vector<8xf32>
    %21 = vector.multi_reduction <maximumf>, %20, %cst_17 [1] : vector<8x128xf32> to vector<8xf32>
    %22 = vector.shape_cast %21 : vector<8xf32> to vector<8x1xf32>
    %23 = vector.broadcast %22 : vector<8x1xf32> to vector<8x128xf32>
    %24 = arith.subf %20, %23 : vector<8x128xf32>
    %25 = math.exp %24 : vector<8x128xf32>
    %cst_18 = arith.constant dense<0.000000e+00> : vector<8xf32>
    %26 = vector.multi_reduction <add>, %25, %cst_18 [1] : vector<8x128xf32> to vector<8xf32>
    %27 = vector.shape_cast %26 : vector<8xf32> to vector<8x1xf32>
    %28 = tpu.reciprocal %27 {approx = true} : vector<8x1xf32> -> vector<8x1xf32>
    %29 = arith.mulf %27, %28 : vector<8x1xf32>
    %cst_19 = arith.constant 2.000000e+00 : f32
    %30 = vector.broadcast %cst_19 : f32 to vector<8x1xf32>
    %31 = arith.subf %30, %29 : vector<8x1xf32>
    %32 = arith.mulf %28, %31 : vector<8x1xf32>
    %33 = vector.extract_strided_slice %25 {offsets = [0, 0], sizes = [8, 104], strides = [1, 1]} : vector<8x128xf32> to vector<8x104xf32>
    %34 = vector.broadcast %32 : vector<8x1xf32> to vector<8x104xf32>
    %35 = arith.mulf %33, %34 : vector<8x104xf32>
    %c0_20 = arith.constant 0 : index
    %c0_21 = arith.constant 0 : index
    %36 = vector.load %arg8[%c0_20, %c0_21] : memref<8x104xf32, #tpu.memory_space<vmem>>, vector<8x104xf32>
    tpu.vector_store %arg8[%c0_20, %c0_21], %35 {strides = array<i32>} : memref<8x104xf32, #tpu.memory_space<vmem>>, vector<8x104xf32>,
    return
  }
  func.func @transform_0(%arg0: i32) -> (i32, i32) {
    %c0_i32 = arith.constant 0 : i32
    %c0_i32_0 = arith.constant 0 : i32
    return %arg0, %c0_i32 : i32, i32
  }
  func.func @transform_1(%arg0: i32) -> (i32, i32) {
    %c0_i32 = arith.constant 0 : i32
    %c0_i32_0 = arith.constant 0 : i32
    %c0_i32_1 = arith.constant 0 : i32
    return %c0_i32, %c0_i32_0 : i32, i32
  }
  func.func @transform_2(%arg0: i32) -> (i32, i32) {
    %c0_i32 = arith.constant 0 : i32
    %c0_i32_0 = arith.constant 0 : i32
    %c0_i32_1 = arith.constant 0 : i32
    return %c0_i32, %c0_i32_0 : i32, i32
  }
  func.func @transform_3(%arg0: i32) -> (i32, i32) {
    %c0_i32 = arith.constant 0 : i32
    %c0_i32_0 = arith.constant 0 : i32
    %c0_i32_1 = arith.constant 0 : i32
    return %c0_i32, %c0_i32_0 : i32, i32
  }
  func.func @transform_4(%arg0: i32) -> (i32, i32) {
    %c0_i32 = arith.constant 0 : i32
    %c0_i32_0 = arith.constant 0 : i32
    %c0_i32_1 = arith.constant 0 : i32
    return %c0_i32, %c0_i32_0 : i32, i32
  }
  func.func @transform_5(%arg0: i32) -> (i32, i32) {
    %c0_i32 = arith.constant 0 : i32
    %c0_i32_0 = arith.constant 0 : i32
    %c0_i32_1 = arith.constant 0 : i32
    return %c0_i32, %c0_i32_0 : i32, i32
  }
  func.func @transform_6(%arg0: i32) -> (i32, i32) {
    %c0_i32 = arith.constant 0 : i32
    %c0_i32_0 = arith.constant 0 : i32
    %c0_i32_1 = arith.constant 0 : i32
    return %c0_i32, %c0_i32_0 : i32, i32
  }
  func.func @transform_7(%arg0: i32) -> (i32, i32) {
    %c0_i32 = arith.constant 0 : i32
    %c0_i32_0 = arith.constant 0 : i32
    return %arg0, %c0_i32 : i32, i32
  }
}

module attributes {stable_mosaic.version = 11 : i64} {
  func.func @_mlp_softmax_kernel(%arg0: i32, %arg1: memref<8x16xf32, #tpu.memory_space<vmem>>, %arg2: memref<16x32xbf16, #tpu.memory_space<vmem>>, %arg3: memref<1x32xf32, #tpu.memory_space<vmem>>, %arg4: memref<32x32xf32, #tpu.memory_space<vmem>>, %arg5: memref<1x32xf32, #tpu.memory_space<vmem>>, %arg6: memref<32x128xf32, #tpu.memory_space<vmem>>, %arg7: memref<1x128xf32, #tpu.memory_space<vmem>>, %arg8: memref<8x104xf32, #tpu.memory_space<vmem>>) attributes {dimension_semantics = [#tpu.dimension_semantics<parallel>], iteration_bounds = array<i64: 1>, scalar_prefetch = 0 : i64, scratch_operands = 0 : i64, tpu.core_type = #tpu.core_type<tc>, window_params = [{transform_indices = @transform_0, window_bounds = array<i64: 8, 16>}, {pipeline_mode = #tpu.pipeline_mode<synchronous>, transform_indices = @transform_1, window_bounds = array<i64: 16, 32>}, {pipeline_mode = #tpu.pipeline_mode<synchronous>, transform_indices = @transform_2, window_bounds = array<i64: 1, 32>}, {pipeline_mode = #tpu.pipeline_mode<synchronous>, transform_indices = @transform_3, window_bounds = array<i64: 32, 32>}, {pipeline_mode = #tpu.pipeline_mode<synchronous>, transform_indices = @transform_4, window_bounds = array<i64: 1, 32>}, {pipeline_mode = #tpu.pipeline_mode<synchronous>, transform_indices = @transform_5, window_bounds = array<i64: 32, 128>}, {pipeline_mode = #tpu.pipeline_mode<synchronous>, transform_indices = @transform_6, window_bounds = array<i64: 1, 128>}, {transform_indices = @transform_7, window_bounds = array<i64: 8, 104>}]} {
    %c0 = arith.constant 0 : index
    %c0_0 = arith.constant 0 : index
    %0 = vector.load %arg1[%c0, %c0_0] : memref<8x16xf32, #tpu.memory_space<vmem>>, vector<8x16xf32>
    %1 = arith.truncf %0 : vector<8x16xf32> to vector<8x16xbf16>
    %c0_1 = arith.constant 0 : index
    %c0_2 = arith.constant 0 : index
    %2 = vector.load %arg2[%c0_1, %c0_2] : memref<16x32xbf16, #tpu.memory_space<vmem>>, vector<16x32xbf16>
    %cst = arith.constant dense<0.000000e+00> : vector<8x32xf32>
    %3 = tpu.matmul %1, %2, %cst {dimension_numbers = #tpu.dot_dimension_numbers<[1], [0], [0], [1], [0, 0, 1, 1], [], []>} : vector<8x16xbf16>, vector<16x32xbf16>, vector<8x32xf32> -> vector<8x32xf32>
    %c0_3 = arith.constant 0 : index
    %c0_4 = arith.constant 0 : index
    %4 = vector.load %arg3[%c0_3, %c0_4] : memref<1x32xf32, #tpu.memory_space<vmem>>, vector<1x32xf32>
    %5 = vector.broadcast %4 : vector<1x32xf32> to vector<8x32xf32>
    %6 = arith.addf %3, %5 : vector<8x32xf32>
    %cst_5 = arith.constant 0.000000e+00 : f32
    %7 = vector.broadcast %cst_5 : f32 to vector<8x32xf32>
    %8 = arith.maximumf %6, %7 : vector<8x32xf32>
    %c0_6 = arith.constant 0 : index
    %c0_7 = arith.constant 0 : index
    %9 = vector.load %arg4[%c0_6, %c0_7] : memref<32x32xf32, #tpu.memory_space<vmem>>, vector<32x32xf32>
    %cst_8 = arith.constant dense<0.000000e+00> : vector<8x32xf32>
    %10 = tpu.matmul %8, %9, %cst_8 {dimension_numbers = #tpu.dot_dimension_numbers<[1], [0], [0], [1], [0, 0, 1, 1], [], []>} : vector<8x32xf32>, vector<32x32xf32>, vector<8x32xf32> -> vector<8x32xf32>
    %c0_9 = arith.constant 0 : index
    %c0_10 = arith.constant 0 : index
    %11 = vector.load %arg5[%c0_9, %c0_10] : memref<1x32xf32, #tpu.memory_space<vmem>>, vector<1x32xf32>
    %12 = vector.broadcast %11 : vector<1x32xf32> to vector<8x32xf32>
    %13 = arith.addf %10, %12 : vector<8x32xf32>
    %cst_11 = arith.constant 0.000000e+00 : f32
    %14 = vector.broadcast %cst_11 : f32 to vector<8x32xf32>
    %15 = arith.maximumf %13, %14 : vector<8x32xf32>
    %c0_12 = arith.constant 0 : index
    %c0_13 = arith.constant 0 : index
    %16 = vector.load %arg6[%c0_12, %c0_13] : memref<32x128xf32, #tpu.memory_space<vmem>>, vector<32x128xf32>
    %cst_14 = arith.constant dense<0.000000e+00> : vector<8x128xf32>
    %17 = tpu.matmul %15, %16, %cst_14 {dimension_numbers = #tpu.dot_dimension_numbers<[1], [0], [0], [1], [0, 0, 1, 1], [], []>} : vector<8x32xf32>, vector<32x128xf32>, vector<8x128xf32> -> vector<8x128xf32>
    %c0_15 = arith.constant 0 : index
    %c0_16 = arith.constant 0 : index
    %18 = vector.load %arg7[%c0_15, %c0_16] : memref<1x128xf32, #tpu.memory_space<vmem>>, vector<1x128xf32>
    %19 = vector.broadcast %18 : vector<1x128xf32> to vector<8x128xf32>
    %20 = arith.addf %17, %19 : vector<8x128xf32>
    %cst_17 = arith.constant dense<0xFF800000> : vector<8xf32>
    %21 = vector.multi_reduction <maximumf>, %20, %cst_17 [1] : vector<8x128xf32> to vector<8xf32>
    %22 = vector.shape_cast %21 : vector<8xf32> to vector<8x1xf32>
    %23 = vector.broadcast %22 : vector<8x1xf32> to vector<8x128xf32>
    %24 = arith.subf %20, %23 : vector<8x128xf32>
    %25 = math.exp %24 : vector<8x128xf32>
    %cst_18 = arith.constant dense<0.000000e+00> : vector<8xf32>
    %26 = vector.multi_reduction <add>, %25, %cst_18 [1] : vector<8x128xf32> to vector<8xf32>
    %27 = vector.shape_cast %26 : vector<8xf32> to vector<8x1xf32>
    %28 = tpu.reciprocal %27 {approx = true} : vector<8x1xf32> -> vector<8x1xf32>
    %29 = arith.mulf %27, %28 : vector<8x1xf32>
    %cst_19 = arith.constant 2.000000e+00 : f32
    %30 = vector.broadcast %cst_19 : f32 to vector<8x1xf32>
    %31 = arith.subf %30, %29 : vector<8x1xf32>
    %32 = arith.mulf %28, %31 : vector<8x1xf32>
    %33 = vector.extract_strided_slice %25 {offsets = [0, 0], sizes = [8, 104], strides = [1, 1]} : vector<8x128xf32> to vector<8x104xf32>
    %34 = vector.broadcast %32 : vector<8x1xf32> to vector<8x104xf32>
    %35 = arith.mulf %33, %34 : vector<8x104xf32>
    %c0_20 = arith.constant 0 : index
    %c0_21 = arith.constant 0 : index
    %36 = vector.load %arg8[%c0_20, %c0_21] : memref<8x104xf32, #tpu.memory_space<vmem>>, vector<8x104xf32>
    tpu.vector_store %arg8[%c0_20, %c0_21], %35 {strides = array<i32>} : memref<8x104xf32, #tpu.memory_space<vmem>>, vector<8x104xf32>,
    return
  }
  func.func @transform_0(%arg0: i32) -> (i32, i32) {
    %c0_i32 = arith.constant 0 : i32
    %c0_i32_0 = arith.constant 0 : i32
    return %arg0, %c0_i32 : i32, i32
  }
  func.func @transform_1(%arg0: i32) -> (i32, i32) {
    %c0_i32 = arith.constant 0 : i32
    %c0_i32_0 = arith.constant 0 : i32
    %c0_i32_1 = arith.constant 0 : i32
    return %c0_i32, %c0_i32_0 : i32, i32
  }
  func.func @transform_2(%arg0: i32) -> (i32, i32) {
    %c0_i32 = arith.constant 0 : i32
    %c0_i32_0 = arith.constant 0 : i32
    %c0_i32_1 = arith.constant 0 : i32
    return %c0_i32, %c0_i32_0 : i32, i32
  }
  func.func @transform_3(%arg0: i32) -> (i32, i32) {
    %c0_i32 = arith.constant 0 : i32
    %c0_i32_0 = arith.constant 0 : i32
    %c0_i32_1 = arith.constant 0 : i32
    return %c0_i32, %c0_i32_0 : i32, i32
  }
  func.func @transform_4(%arg0: i32) -> (i32, i32) {
    %c0_i32 = arith.constant 0 : i32
    %c0_i32_0 = arith.constant 0 : i32
    %c0_i32_1 = arith.constant 0 : i32
    return %c0_i32, %c0_i32_0 : i32, i32
  }
  func.func @transform_5(%arg0: i32) -> (i32, i32) {
    %c0_i32 = arith.constant 0 : i32
    %c0_i32_0 = arith.constant 0 : i32
    %c0_i32_1 = arith.constant 0 : i32
    return %c0_i32, %c0_i32_0 : i32, i32
  }
  func.func @transform_6(%arg0: i32) -> (i32, i32) {
    %c0_i32 = arith.constant 0 : i32
    %c0_i32_0 = arith.constant 0 : i32
    %c0_i32_1 = arith.constant 0 : i32
    return %c0_i32, %c0_i32_0 : i32, i32
  }
  func.func @transform_7(%arg0: i32) -> (i32, i32) {
    %c0_i32 = arith.constant 0 : i32
    %c0_i32_0 = arith.constant 0 : i32
    return %arg0, %c0_i32 : i32, i32
  }
}

</mosaic_0001>

<bundles_post_ra>
// kernel: tpu_custom_call.1
= control target key start
LH: loop header
LB: loop body
LE: loop exit
PB: predicated region body
PF: predicated region fallthrough
CT: control target
= control target key end

     0   :  { %12 = vsyncpa [#allocation3], 0  ;;  %s662_s0 = inlined_call_operand.hbm [shape: f32[8,16], index: 0, kind: input, shape index: {}]   ;;  %s663_s1 = inlined_call_operand.hbm [shape: bf16[16,32], index: 1, kind: input, shape index: {}]   ;;  %s664_s2 = inlined_call_operand.vmem [shape: f32[1,32], index: 2, kind: input, shape index: {}]   ;;  %s665_s3 = inlined_call_operand.hbm [shape: f32[32,32], index: 3, kind: input, shape index: {}]   ;;  %s666_s4 = inlined_call_operand.vmem [shape: f32[1,32], index: 4, kind: input, shape index: {}]   ;;  %s667_s5 = inlined_call_operand.hbm [shape: f32[32,128], index: 5, kind: input, shape index: {}]   ;;  %s668_s6 = inlined_call_operand.vmem [shape: f32[1,128], index: 6, kind: input, shape index: {}]   ;;  %s669_s7 = inlined_call_operand.hbm [shape: f32[8,104], index: 7, kind: output, shape index: {}]  }
   0x1   :  { %13 = vsyncpa [#allocation6], 0 }
   0x2   :  { %14 = vsyncpa [#allocation9], 0 }
   0x3   :  { %15 = vsyncpa [#allocation4], 0  ;;  %s538_s24 = smov [#allocation5]   ;;  %s420_s28 = scalar_lea.hbm %s663_s1, 128 }
   0x4   :  { %s31_s25 = sshll.u32 %s538_s24, 4  ;;  %p421_p0 = scmp.ne.s32.totalorder %s663_s1, %s420_s28  ;;  %s32_s25 = int_to_ptr.vmem [resolvable:$true] %s31_s25 }
   0x5   :  { %p424_p1 = scmp.lt.u32.totalorder %s420_s28, %s663_s1 }
   0x7   :  { %p426_p2 = pnand %p424_p1, %p421_p0 }
   0x9   :  { %429 = shalt.err (!%p426_p2)
}
   0xa   :  { %s430_s10 = scalar_lea.vmem %s32_s25, 128  ;;  %p435_p4 = scmp.lt.s32.totalorder %s32_s25, %s32_s25 }
   0xb   :  { %p431_p3 = scmp.ne.s32.totalorder %s32_s25, %s430_s10  ;;  %p436_p5 = scmp.lt.s32.totalorder %s430_s10, %s430_s10 }
   0xd   :  { %p437_p6 = por %p436_p5, %p435_p4 }
   0xf   :  { %p438_p7 = pnand %p437_p6, %p431_p3 }
  0x11   :  { %441 = shalt.err (!%p438_p7)
}
  0x12   :  { %s539_s11 = smov 64   ;;  %s540_s12 = smov 4  }
  0x13   :  { %37 = dma.hbm_to_vmem [thread:$0]  %s663_s1, 128, %s32_s25, [#allocation6], %s539_s11, %s539_s11, %s540_s12  }
  0x14   :  { %s541_s15 = smov [#allocation2]   ;;  %s542_s17 = smov [#allocation7]  }
  0x15   :  { %s22_s16 = sshll.u32 %s541_s15, 4  ;;  %s45_s18 = sshll.u32 %s542_s17, 4  ;;  %s23_s16 = int_to_ptr.vmem [resolvable:$true] %s22_s16  ;;  %s46_s18 = int_to_ptr.vmem [resolvable:$true] %s45_s18 }
  0x16   :  { %s442_s21 = scalar_lea.hbm %s662_s0, 128 }
  0x17   :  { %p443_p8 = scmp.ne.s32.totalorder %s662_s0, %s442_s21  ;;  %p446_p9 = scmp.lt.u32.totalorder %s442_s21, %s662_s0 }
  0x19   :  { %p448_p10 = pnand %p446_p9, %p443_p8 }
  0x1b   :  { %451 = shalt.err (!%p448_p10)
}
  0x1c   :  { %s452_s1 = scalar_lea.vmem %s23_s16, 128  ;;  %p457_p12 = scmp.lt.s32.totalorder %s23_s16, %s23_s16 }
  0x1d   :  { %p453_p11 = scmp.ne.s32.totalorder %s23_s16, %s452_s1  ;;  %p458_p13 = scmp.lt.s32.totalorder %s452_s1, %s452_s1 }
  0x1f   :  { %p459_p0 = por %p458_p13, %p457_p12 }
  0x21   :  { %p460_p1 = pnand %p459_p0, %p453_p11 }
  0x23   :  { %463 = shalt.err (!%p460_p1)
}
  0x24   :  { %25 = dma.hbm_to_vmem [thread:$0]  %s662_s0, 128, %s23_s16, [#allocation3]  }
  0x25   :  { %s464_s30 = scalar_lea.hbm %s665_s3, 512 }
  0x26   :  { %p465_p2 = scmp.ne.s32.totalorder %s665_s3, %s464_s30  ;;  %p468_p3 = scmp.lt.u32.totalorder %s464_s30, %s665_s3 }
  0x28   :  { %p470_p4 = pnand %p468_p3, %p465_p2 }
  0x2a   :  { %473 = shalt.err (!%p470_p4)
}
  0x2b   :  { %s474_s12 = scalar_lea.vmem %s46_s18, 512  ;;  %p479_p6 = scmp.lt.s32.totalorder %s46_s18, %s46_s18 }
  0x2c   :  { %p475_p5 = scmp.ne.s32.totalorder %s46_s18, %s474_s12  ;;  %p480_p7 = scmp.lt.s32.totalorder %s474_s12, %s474_s12 }
  0x2e   :  { %p481_p8 = por %p480_p7, %p479_p6 }
  0x30   :  { %p482_p9 = pnand %p481_p8, %p475_p5 }
  0x32   :  { %485 = shalt.err (!%p482_p9)
}
  0x33   :  { %s543_s0 = smov 128   ;;  %s544_s13 = smov 8  }
  0x34   :  { %51 = dma.hbm_to_vmem [thread:$0]  %s665_s3, 512, %s46_s18, [#allocation6], %s543_s0, %s543_s0, %s544_s13  }
  0x35   :  { %s545_s16 = smov [#allocation8]   ;;  %s486_s21 = scalar_lea.hbm %s667_s5, 512 }
  0x36   :  { %s59_s17 = sshll.u32 %s545_s16, 4  ;;  %p487_p10 = scmp.ne.s32.totalorder %s667_s5, %s486_s21  ;;  %s60_s17 = int_to_ptr.vmem [resolvable:$true] %s59_s17 }
  0x37   :  { %p490_p11 = scmp.lt.u32.totalorder %s486_s21, %s667_s5 }
  0x39   :  { %p492_p12 = pnand %p490_p11, %p487_p10 }
  0x3b   :  { %495 = shalt.err (!%p492_p12)
}
  0x3c   :  { %s496_s1 = scalar_lea.vmem %s60_s17, 512  ;;  %p501_p0 = scmp.lt.s32.totalorder %s60_s17, %s60_s17 }
  0x3d   :  { %p497_p13 = scmp.ne.s32.totalorder %s60_s17, %s496_s1  ;;  %p502_p1 = scmp.lt.s32.totalorder %s496_s1, %s496_s1 }
  0x3f   :  { %p503_p2 = por %p502_p1, %p501_p0 }
  0x41   :  { %p504_p3 = pnand %p503_p2, %p497_p13 }
  0x43   :  { %507 = shalt.err (!%p504_p3)
}
  0x44   :  { %65 = dma.hbm_to_vmem [thread:$0]  %s667_s5, 512, %s60_s17, [#allocation9], %s543_s0, %s543_s0, %s544_s13  }
  0x45   :  { %530 = dma.done.wait [#allocation3], 128  }
  0x46   :  { %531 = vsyncadd [#allocation3], 4294967168 }
  0x47   :  { %532 = dma.done.wait [#allocation6], 640  }
  0x48   :  { %533 = vsyncadd [#allocation6], 4294966656 }
  0x49   :  { %534 = dma.done.wait [#allocation9], 512  }
  0x4a   :  { %535 = vsyncadd [#allocation9], 4294966784  ;;  %v546_v0 = vmov 0.0   ;;  %vm547_vm0 = vmmov 0   ;;  %v548_v1 = vmov 0.0|0.0   ;;  %v415_v2 = vld [vmem:[#allocation5] sm:$0xff]  }
  0x4b   :  { %363 = vmatprep.subr.bf16.mxu0 %v546_v0  ;;  %365 = vmatprep.mubr.msk.bf16.mxu0 %vm547_vm0, %v546_v0  ;;  %v81_v3 = vld [vmem:[#allocation2] sm:$0xff]  ;;  %v143_v4 = vld [vmem:[#allocation7] sm:$0xff]  ;;  %v144_v5 = vld [vmem:[#allocation7 + $0x8] sm:$0xff]  ;;  %vm98_vm1 = vcmask 130048   ;;  %vm154_vm2 = vcmask 261120   ;;  %vm325_vm3 = vcmask 850944  }
  0x4c   :  { %391 = vmatprep.subr.bf16.mxu1 %v548_v1  ;;  %377 = vmatprep.mubr.msk.f32.mxu1 %vm547_vm0, %v546_v0  ;;  %v82_v6 = vpack.c.bf16 %v81_v3, %v81_v3  ;;  %v392_v7 = vpack.c.bf16 %v144_v5, %v143_v4  ;;  %v145_v8 = vld [vmem:[#allocation7 + $0x10] sm:$0xff]  ;;  %v146_v9 = vld [vmem:[#allocation7 + $0x18] sm:$0xff]  ;;  %v229_v11 = vld [vmem:[#allocation8] sm:$0xff] }
  0x4d   :  { %364 = vmatpush3.bf16.msra.mxu0 %v415_v2  ;;  %v395_v10 = vpack.c.bf16 %v146_v9, %v145_v8  ;;  %v230_v12 = vld [vmem:[#allocation8 + $0x8] sm:$0xff]  ;;  %v344_v14 = vld [vmem:[%s664_s2] ss:$0 sm:$0xff]  ;;  %v232_v22 = vld [vmem:[#allocation8 + $0x18] sm:$0xff] }
  0x4e   :  { %397 = vmatprep.subr.bf16.mxu0 %v548_v1  ;;  %393 = vmatpush3.bf16.msra.mxu1 %v392_v7  ;;  %v398_v13 = vpack.c.bf16 %v230_v12, %v229_v11  ;;  %v231_v21 = vld [vmem:[#allocation8 + $0x10] sm:$0xff] }
  0x4f   :  { %394 = vmatprep.subr.bf16.mxu1 %v548_v1  ;;  %v401_v23 = vpack.c.bf16 %v232_v22, %v231_v21  ;;  %v347_v24 = vld [vmem:[%s666_s4] ss:$0 sm:$0xff]  ;;  %s549_s4 = smov [#allocation10]  }
  0x50   :  { %366 = vmatmul.mubr.msk.bf16.vlgmr.msra.gmra.mrb[0].mxu0 %vm98_vm1, %v82_v6  ;;  %v349_v29 = vld [vmem:[%s668_s6] ss:$0 sm:$0xff]  ;;  %s333_s30 = sshll.u32 %s549_s4, 4  ;;  %s334_s30 = int_to_ptr.vmem [resolvable:$true] %s333_s30 }
  0x51   :  { %388 = vmatprep.mubr.msk.f32.mxu0 %vm547_vm0, %v546_v0  ;;  %399 = vmatpush3.bf16.msra.mxu0 %v398_v13  ;;  %s508_s6 = scalar_lea.vmem %s334_s30, 128  ;;  %p513_p5 = scmp.lt.s32.totalorder %s334_s30, %s334_s30 }
  0x52   :  { %396 = vmatpush3.bf16.msra.mxu1 %v395_v10  ;;  %400 = vmatprep.subr.bf16.mxu0 %v548_v1  ;;  %p509_p4 = scmp.ne.s32.totalorder %s334_s30, %s508_s6  ;;  %p514_p6 = scmp.lt.s32.totalorder %s508_s6, %s508_s6 }
  0x54   :  { %p515_p7 = por %p514_p6, %p513_p5 }
  0x55   :  { %402 = vmatpush3.bf16.msra.mxu0 %v401_v23 }
  0x56   :  { %p516_p8 = pnand %p515_p7, %p509_p4 }
 0x123   :  { %v136_v15 = vpop.f32.mrb[0].mxu0 }
 0x124   :  { %v137_v16 = vadd.f32 %v344_v14, %v136_v15  ;;  %v367_v17 = vpop.f32.mrb[1].mxu0 }
 0x125   :  { %v139_v18 = vpop.f32.mrb[2].mxu0 }
 0x126   :  { %v142_v19 = vmax.f32 %v137_v16, 0.0  ;;  %v368_v20 = vpop.f32.mrb[3].mxu0 }
 0x128   :  { %378 = vmatmul.mubr.msk.f32.vlgmr.msra.gmra.mrb[0].mxu1 %vm154_vm2, %v142_v19 }
 0x1fb   :  { %v224_v25 = vpop.f32.mrb[0].mxu1 }
 0x1fc   :  { %v225_v26 = vadd.f32 %v347_v24, %v224_v25  ;;  %v379_v27 = vpop.f32.mrb[1].mxu1 }
 0x1fe   :  { %v228_v28 = vmax.f32 %v225_v26, 0.0 }
 0x200   :  { %389 = vmatmul.mubr.msk.f32.vlgmr.msra.gmra.mrb[4].mxu0 %vm154_vm2, %v228_v28 }
 0x2d3   :  { %v309_v30 = vpop.f32.mrb[4].mxu0 }
 0x2d4   :  { %v310_v31 = vadd.f32 %v349_v29, %v309_v30  ;;  %v390_v32 = vpop.f32.mrb[5].mxu0 }
 0x2d6   :  { %313 = vmax.xlane.f32.xlu0 %v310_v31 }
 0x363   :  { %v314_v33 = vpop.xlane.xlu0 %313 }
 0x364   :  { %v315_v34 = vsub.f32 %v310_v31, %v314_v33 }
 0x366   :  { %v316_v35 = vmul.f32 1.442695, %v315_v34 }
 0x368   :  { %416 = vpow2.f32 %v316_v35 }
 0x372   :  { %v417_v36 = vpop.eup %416 }
 0x373   :  { %318 = vadd.xlane.f32.xlu0 %v417_v36 }
 0x400   :  { %v319_v37 = vpop.xlane.xlu0 %318 }
 0x401   :  { %418 = vrcp.f32 %v319_v37 }
 0x40b   :  { %v419_v38 = vpop.eup %418 }
 0x40c   :  { %v321_v39 = vmul.f32 %v419_v38, %v319_v37 }
 0x40e   :  { %v322_v40 = vsub.f32 2.0, %v321_v39 }
 0x410   :  { %v323_v41 = vmul.f32 %v419_v38, %v322_v40 }
 0x412   :  { %v324_v42 = vmul.f32 %v417_v36, %v323_v41 }
 0x414   :  { %326 = vst.msk [vmem:[#allocation10] sm:$0xff] %vm325_vm3, %v324_v42 }
 0x415   :  { %519 = shalt.err (!%p516_p8)
}
 0x416   :  { %s520_s10 = scalar_lea.hbm %s669_s7, 128 }
 0x417   :  { %p521_p9 = scmp.ne.s32.totalorder %s669_s7, %s520_s10  ;;  %p524_p10 = scmp.lt.u32.totalorder %s520_s10, %s669_s7 }
 0x419   :  { %p526_p11 = pnand %p524_p10, %p521_p9 }
 0x41b   :  { %529 = shalt.err (!%p526_p11)
}
 0x41c   :  { %336 = dma.vmem_to_hbm [thread:$0]  %s334_s30, 128, %s669_s7, [#allocation4]  }
 0x41d   :  { %536 = dma.done.wait [#allocation4], 128  }
 0x41e   :  { %537 = vsyncadd [#allocation4], 4294967168 }
 0x41f   :  { %340 = vsyncpa [#allocation3], 1 }
 0x420   :  { %341 = vsyncpa [#allocation6], 1 }
 0x421   :  { %342 = vsyncpa [#allocation9], 1 }
 0x422   :  { %343 = vsyncpa [#allocation4], 1 }

// kernel: tpu_custom_call.1
= control target key start
LH: loop header
LB: loop body
LE: loop exit
PB: predicated region body
PF: predicated region fallthrough
CT: control target
= control target key end

     0   :  { %12 = vsyncpa [#allocation3], 0  ;;  %s662_s0 = inlined_call_operand.hbm [shape: f32[8,16], index: 0, kind: input, shape index: {}]   ;;  %s663_s1 = inlined_call_operand.hbm [shape: bf16[16,32], index: 1, kind: input, shape index: {}]   ;;  %s664_s2 = inlined_call_operand.vmem [shape: f32[1,32], index: 2, kind: input, shape index: {}]   ;;  %s665_s3 = inlined_call_operand.hbm [shape: f32[32,32], index: 3, kind: input, shape index: {}]   ;;  %s666_s4 = inlined_call_operand.vmem [shape: f32[1,32], index: 4, kind: input, shape index: {}]   ;;  %s667_s5 = inlined_call_operand.hbm [shape: f32[32,128], index: 5, kind: input, shape index: {}]   ;;  %s668_s6 = inlined_call_operand.vmem [shape: f32[1,128], index: 6, kind: input, shape index: {}]   ;;  %s669_s7 = inlined_call_operand.hbm [shape: f32[8,104], index: 7, kind: output, shape index: {}]  }
   0x1   :  { %13 = vsyncpa [#allocation6], 0 }
   0x2   :  { %14 = vsyncpa [#allocation9], 0 }
   0x3   :  { %15 = vsyncpa [#allocation4], 0  ;;  %s538_s24 = smov [#allocation5]   ;;  %s420_s28 = scalar_lea.hbm %s663_s1, 128 }
   0x4   :  { %s31_s25 = sshll.u32 %s538_s24, 4  ;;  %p421_p0 = scmp.ne.s32.totalorder %s663_s1, %s420_s28  ;;  %s32_s25 = int_to_ptr.vmem [resolvable:$true] %s31_s25 }
   0x5   :  { %p424_p1 = scmp.lt.u32.totalorder %s420_s28, %s663_s1 }
   0x7   :  { %p426_p2 = pnand %p424_p1, %p421_p0 }
   0x9   :  { %429 = shalt.err (!%p426_p2)
}
   0xa   :  { %s430_s10 = scalar_lea.vmem %s32_s25, 128  ;;  %p435_p4 = scmp.lt.s32.totalorder %s32_s25, %s32_s25 }
   0xb   :  { %p431_p3 = scmp.ne.s32.totalorder %s32_s25, %s430_s10  ;;  %p436_p5 = scmp.lt.s32.totalorder %s430_s10, %s430_s10 }
   0xd   :  { %p437_p6 = por %p436_p5, %p435_p4 }
   0xf   :  { %p438_p7 = pnand %p437_p6, %p431_p3 }
  0x11   :  { %441 = shalt.err (!%p438_p7)
}
  0x12   :  { %s539_s11 = smov 64   ;;  %s540_s12 = smov 4  }
  0x13   :  { %37 = dma.hbm_to_vmem [thread:$0]  %s663_s1, 128, %s32_s25, [#allocation6], %s539_s11, %s539_s11, %s540_s12  }
  0x14   :  { %s541_s15 = smov [#allocation2]   ;;  %s542_s17 = smov [#allocation7]  }
  0x15   :  { %s22_s16 = sshll.u32 %s541_s15, 4  ;;  %s45_s18 = sshll.u32 %s542_s17, 4  ;;  %s23_s16 = int_to_ptr.vmem [resolvable:$true] %s22_s16  ;;  %s46_s18 = int_to_ptr.vmem [resolvable:$true] %s45_s18 }
  0x16   :  { %s442_s21 = scalar_lea.hbm %s662_s0, 128 }
  0x17   :  { %p443_p8 = scmp.ne.s32.totalorder %s662_s0, %s442_s21  ;;  %p446_p9 = scmp.lt.u32.totalorder %s442_s21, %s662_s0 }
  0x19   :  { %p448_p10 = pnand %p446_p9, %p443_p8 }
  0x1b   :  { %451 = shalt.err (!%p448_p10)
}
  0x1c   :  { %s452_s1 = scalar_lea.vmem %s23_s16, 128  ;;  %p457_p12 = scmp.lt.s32.totalorder %s23_s16, %s23_s16 }
  0x1d   :  { %p453_p11 = scmp.ne.s32.totalorder %s23_s16, %s452_s1  ;;  %p458_p13 = scmp.lt.s32.totalorder %s452_s1, %s452_s1 }
  0x1f   :  { %p459_p0 = por %p458_p13, %p457_p12 }
  0x21   :  { %p460_p1 = pnand %p459_p0, %p453_p11 }
  0x23   :  { %463 = shalt.err (!%p460_p1)
}
  0x24   :  { %25 = dma.hbm_to_vmem [thread:$0]  %s662_s0, 128, %s23_s16, [#allocation3]  }
  0x25   :  { %s464_s30 = scalar_lea.hbm %s665_s3, 512 }
  0x26   :  { %p465_p2 = scmp.ne.s32.totalorder %s665_s3, %s464_s30  ;;  %p468_p3 = scmp.lt.u32.totalorder %s464_s30, %s665_s3 }
  0x28   :  { %p470_p4 = pnand %p468_p3, %p465_p2 }
  0x2a   :  { %473 = shalt.err (!%p470_p4)
}
  0x2b   :  { %s474_s12 = scalar_lea.vmem %s46_s18, 512  ;;  %p479_p6 = scmp.lt.s32.totalorder %s46_s18, %s46_s18 }
  0x2c   :  { %p475_p5 = scmp.ne.s32.totalorder %s46_s18, %s474_s12  ;;  %p480_p7 = scmp.lt.s32.totalorder %s474_s12, %s474_s12 }
  0x2e   :  { %p481_p8 = por %p480_p7, %p479_p6 }
  0x30   :  { %p482_p9 = pnand %p481_p8, %p475_p5 }
  0x32   :  { %485 = shalt.err (!%p482_p9)
}
  0x33   :  { %s543_s0 = smov 128   ;;  %s544_s13 = smov 8  }
  0x34   :  { %51 = dma.hbm_to_vmem [thread:$0]  %s665_s3, 512, %s46_s18, [#allocation6], %s543_s0, %s543_s0, %s544_s13  }
  0x35   :  { %s545_s16 = smov [#allocation8]   ;;  %s486_s21 = scalar_lea.hbm %s667_s5, 512 }
  0x36   :  { %s59_s17 = sshll.u32 %s545_s16, 4  ;;  %p487_p10 = scmp.ne.s32.totalorder %s667_s5, %s486_s21  ;;  %s60_s17 = int_to_ptr.vmem [resolvable:$true] %s59_s17 }
  0x37   :  { %p490_p11 = scmp.lt.u32.totalorder %s486_s21, %s667_s5 }
  0x39   :  { %p492_p12 = pnand %p490_p11, %p487_p10 }
  0x3b   :  { %495 = shalt.err (!%p492_p12)
}
  0x3c   :  { %s496_s1 = scalar_lea.vmem %s60_s17, 512  ;;  %p501_p0 = scmp.lt.s32.totalorder %s60_s17, %s60_s17 }
  0x3d   :  { %p497_p13 = scmp.ne.s32.totalorder %s60_s17, %s496_s1  ;;  %p502_p1 = scmp.lt.s32.totalorder %s496_s1, %s496_s1 }
  0x3f   :  { %p503_p2 = por %p502_p1, %p501_p0 }
  0x41   :  { %p504_p3 = pnand %p503_p2, %p497_p13 }
  0x43   :  { %507 = shalt.err (!%p504_p3)
}
  0x44   :  { %65 = dma.hbm_to_vmem [thread:$0]  %s667_s5, 512, %s60_s17, [#allocation9], %s543_s0, %s543_s0, %s544_s13  }
  0x45   :  { %530 = dma.done.wait [#allocation3], 128  }
  0x46   :  { %531 = vsyncadd [#allocation3], 4294967168 }
  0x47   :  { %532 = dma.done.wait [#allocation6], 640  }
  0x48   :  { %533 = vsyncadd [#allocation6], 4294966656 }
  0x49   :  { %534 = dma.done.wait [#allocation9], 512  }
  0x4a   :  { %535 = vsyncadd [#allocation9], 4294966784  ;;  %v546_v0 = vmov 0.0   ;;  %vm547_vm0 = vmmov 0   ;;  %v548_v1 = vmov 0.0|0.0   ;;  %v415_v2 = vld [vmem:[#allocation5] sm:$0xff]  }
  0x4b   :  { %363 = vmatprep.subr.bf16.mxu0 %v546_v0  ;;  %365 = vmatprep.mubr.msk.bf16.mxu0 %vm547_vm0, %v546_v0  ;;  %v81_v3 = vld [vmem:[#allocation2] sm:$0xff]  ;;  %v143_v4 = vld [vmem:[#allocation7] sm:$0xff]  ;;  %v144_v5 = vld [vmem:[#allocation7 + $0x8] sm:$0xff]  ;;  %vm98_vm1 = vcmask 130048   ;;  %vm154_vm2 = vcmask 261120   ;;  %vm325_vm3 = vcmask 850944  }
  0x4c   :  { %391 = vmatprep.subr.bf16.mxu1 %v548_v1  ;;  %377 = vmatprep.mubr.msk.f32.mxu1 %vm547_vm0, %v546_v0  ;;  %v82_v6 = vpack.c.bf16 %v81_v3, %v81_v3  ;;  %v392_v7 = vpack.c.bf16 %v144_v5, %v143_v4  ;;  %v145_v8 = vld [vmem:[#allocation7 + $0x10] sm:$0xff]  ;;  %v146_v9 = vld [vmem:[#allocation7 + $0x18] sm:$0xff]  ;;  %v229_v11 = vld [vmem:[#allocation8] sm:$0xff] }
  0x4d   :  { %364 = vmatpush3.bf16.msra.mxu0 %v415_v2  ;;  %v395_v10 = vpack.c.bf16 %v146_v9, %v145_v8  ;;  %v230_v12 = vld [vmem:[#allocation8 + $0x8] sm:$0xff]  ;;  %v344_v14 = vld [vmem:[%s664_s2] ss:$0 sm:$0xff]  ;;  %v232_v22 = vld [vmem:[#allocation8 + $0x18] sm:$0xff] }
  0x4e   :  { %397 = vmatprep.subr.bf16.mxu0 %v548_v1  ;;  %393 = vmatpush3.bf16.msra.mxu1 %v392_v7  ;;  %v398_v13 = vpack.c.bf16 %v230_v12, %v229_v11  ;;  %v231_v21 = vld [vmem:[#allocation8 + $0x10] sm:$0xff] }
  0x4f   :  { %394 = vmatprep.subr.bf16.mxu1 %v548_v1  ;;  %v401_v23 = vpack.c.bf16 %v232_v22, %v231_v21  ;;  %v347_v24 = vld [vmem:[%s666_s4] ss:$0 sm:$0xff]  ;;  %s549_s4 = smov [#allocation10]  }
  0x50   :  { %366 = vmatmul.mubr.msk.bf16.vlgmr.msra.gmra.mrb[0].mxu0 %vm98_vm1, %v82_v6  ;;  %v349_v29 = vld [vmem:[%s668_s6] ss:$0 sm:$0xff]  ;;  %s333_s30 = sshll.u32 %s549_s4, 4  ;;  %s334_s30 = int_to_ptr.vmem [resolvable:$true] %s333_s30 }
  0x51   :  { %388 = vmatprep.mubr.msk.f32.mxu0 %vm547_vm0, %v546_v0  ;;  %399 = vmatpush3.bf16.msra.mxu0 %v398_v13  ;;  %s508_s6 = scalar_lea.vmem %s334_s30, 128  ;;  %p513_p5 = scmp.lt.s32.totalorder %s334_s30, %s334_s30 }
  0x52   :  { %396 = vmatpush3.bf16.msra.mxu1 %v395_v10  ;;  %400 = vmatprep.subr.bf16.mxu0 %v548_v1  ;;  %p509_p4 = scmp.ne.s32.totalorder %s334_s30, %s508_s6  ;;  %p514_p6 = scmp.lt.s32.totalorder %s508_s6, %s508_s6 }
  0x54   :  { %p515_p7 = por %p514_p6, %p513_p5 }
  0x55   :  { %402 = vmatpush3.bf16.msra.mxu0 %v401_v23 }
  0x56   :  { %p516_p8 = pnand %p515_p7, %p509_p4 }
 0x123   :  { %v136_v15 = vpop.f32.mrb[0].mxu0 }
 0x124   :  { %v137_v16 = vadd.f32 %v344_v14, %v136_v15  ;;  %v367_v17 = vpop.f32.mrb[1].mxu0 }
 0x125   :  { %v139_v18 = vpop.f32.mrb[2].mxu0 }
 0x126   :  { %v142_v19 = vmax.f32 %v137_v16, 0.0  ;;  %v368_v20 = vpop.f32.mrb[3].mxu0 }
 0x128   :  { %378 = vmatmul.mubr.msk.f32.vlgmr.msra.gmra.mrb[0].mxu1 %vm154_vm2, %v142_v19 }
 0x1fb   :  { %v224_v25 = vpop.f32.mrb[0].mxu1 }
 0x1fc   :  { %v225_v26 = vadd.f32 %v347_v24, %v224_v25  ;;  %v379_v27 = vpop.f32.mrb[1].mxu1 }
 0x1fe   :  { %v228_v28 = vmax.f32 %v225_v26, 0.0 }
 0x200   :  { %389 = vmatmul.mubr.msk.f32.vlgmr.msra.gmra.mrb[4].mxu0 %vm154_vm2, %v228_v28 }
 0x2d3   :  { %v309_v30 = vpop.f32.mrb[4].mxu0 }
 0x2d4   :  { %v310_v31 = vadd.f32 %v349_v29, %v309_v30  ;;  %v390_v32 = vpop.f32.mrb[5].mxu0 }
 0x2d6   :  { %313 = vmax.xlane.f32.xlu0 %v310_v31 }
 0x363   :  { %v314_v33 = vpop.xlane.xlu0 %313 }
 0x364   :  { %v315_v34 = vsub.f32 %v310_v31, %v314_v33 }
 0x366   :  { %v316_v35 = vmul.f32 1.442695, %v315_v34 }
 0x368   :  { %416 = vpow2.f32 %v316_v35 }
 0x372   :  { %v417_v36 = vpop.eup %416 }
 0x373   :  { %318 = vadd.xlane.f32.xlu0 %v417_v36 }
 0x400   :  { %v319_v37 = vpop.xlane.xlu0 %318 }
 0x401   :  { %418 = vrcp.f32 %v319_v37 }
 0x40b   :  { %v419_v38 = vpop.eup %418 }
 0x40c   :  { %v321_v39 = vmul.f32 %v419_v38, %v319_v37 }
 0x40e   :  { %v322_v40 = vsub.f32 2.0, %v321_v39 }
 0x410   :  { %v323_v41 = vmul.f32 %v419_v38, %v322_v40 }
 0x412   :  { %v324_v42 = vmul.f32 %v417_v36, %v323_v41 }
 0x414   :  { %326 = vst.msk [vmem:[#allocation10] sm:$0xff] %vm325_vm3, %v324_v42 }
 0x415   :  { %519 = shalt.err (!%p516_p8)
}
 0x416   :  { %s520_s10 = scalar_lea.hbm %s669_s7, 128 }
 0x417   :  { %p521_p9 = scmp.ne.s32.totalorder %s669_s7, %s520_s10  ;;  %p524_p10 = scmp.lt.u32.totalorder %s520_s10, %s669_s7 }
 0x419   :  { %p526_p11 = pnand %p524_p10, %p521_p9 }
 0x41b   :  { %529 = shalt.err (!%p526_p11)
}
 0x41c   :  { %336 = dma.vmem_to_hbm [thread:$0]  %s334_s30, 128, %s669_s7, [#allocation4]  }
 0x41d   :  { %536 = dma.done.wait [#allocation4], 128  }
 0x41e   :  { %537 = vsyncadd [#allocation4], 4294967168 }
 0x41f   :  { %340 = vsyncpa [#allocation3], 1 }
 0x420   :  { %341 = vsyncpa [#allocation6], 1 }
 0x421   :  { %342 = vsyncpa [#allocation9], 1 }
 0x422   :  { %343 = vsyncpa [#allocation4], 1 }

</bundles_post_ra>
